<compile_context>
chip_gen: v7x
topology: tpu7x:2x2x1
jax: 0.10.0
libtpu: 0.0.40
codegen_flags: <defaults>
</compile_context>

<pallas_src>
import functools
import math

import jax
import jax.numpy as jnp
from jax.experimental import pallas as pl
from jax.experimental.pallas import tpu as pltpu

# Large finite negative mask value: identical to -inf after exp() underflow,
# but avoids NaN (0/0) if a fully-masked/padded row ever appears.
_MASK_VALUE = -1e30


def _mha_fused_kernel(x_ref, w_qkv_ref, w_proj_ref, b_ref, o_ref,
                      *, num_heads, head_size):
    """Fused QKV projection + per-head causal attention + output projection
    for one batch row.

    x_ref     : (1, T, C)
    w_qkv_ref : (C, 3*H*Hs)  [Q | K | V] slabs; head h at cols h*Hs:(h+1)*Hs
    w_proj_ref: (H*Hs, C)
    b_ref     : (1, C)
    o_ref     : (1, T, C)
    """
    x = x_ref[0].astype(jnp.float32)                 # (T, C)
    w_qkv = w_qkv_ref[...].astype(jnp.float32)       # (C, 3*H*Hs)
    w_proj = w_proj_ref[...].astype(jnp.float32)     # (H*Hs, C)
    b = b_ref[...].astype(jnp.float32)               # (1, C)

    T = x.shape[0]
    C = o_ref.shape[-1]
    HH = num_heads * head_size
    scale = jnp.float32(head_size) ** -0.5

    # One wide MXU matmul produces q, k, v for all heads: (T, C) @ (C, 3*H*Hs).
    qkv = jnp.dot(x, w_qkv, preferred_element_type=jnp.float32)   # (T, 3*H*Hs)

    # Causal mask, hoisted out of the head loop.
    row = jax.lax.broadcasted_iota(jnp.int32, (T, T), 0)
    col = jax.lax.broadcasted_iota(jnp.int32, (T, T), 1)
    causal = col <= row                                           # lower-triangular

    acc = jnp.zeros((T, C), jnp.float32)
    for h in range(num_heads):                                    # static, unrolled
        lo = h * head_size
        qh = qkv[:, lo:lo + head_size] * scale                    # scale q, not scores
        kh = qkv[:, HH + lo:HH + lo + head_size]
        vh = qkv[:, 2 * HH + lo:2 * HH + lo + head_size]

        # q @ k^T without materializing k.T (contract the Hs axes directly).
        s = jax.lax.dot_general(
            qh, kh, (((1,), (1,)), ((), ())),
            preferred_element_type=jnp.float32)                   # (T, T)
        s = jnp.where(causal, s, _MASK_VALUE)

        # numerically-stable softmax over the last axis (kept in f32)
        m = jnp.max(s, axis=-1, keepdims=True)
        p = jnp.exp(s - m)
        p = p / jnp.sum(p, axis=-1, keepdims=True)
        # TODO(synk): attention-dropout (p=0.2) skipped (eval mode).

        oh = jnp.dot(p, vh, preferred_element_type=jnp.float32)   # (T, Hs)

        # Fold the output projection: y @ Wp == sum_h  oh @ Wp[h*Hs:(h+1)*Hs, :]
        # (mathematically identical to concatenating heads then projecting).
        acc = acc + jnp.dot(oh, w_proj[lo:lo + head_size, :],
                            preferred_element_type=jnp.float32)   # (T, C)

    o_ref[0] = (acc + b).astype(o_ref.dtype)


def multi_head_attention(x, wq, wk, wv, w_proj, b_proj):
    """x: (B, T, C); wq/wk/wv: (H, C, Hs); w_proj: (H*Hs, C); b_proj: (C,)."""
    B, T, C = x.shape
    H, _, Hs = wq.shape
    HH = H * Hs

    # (H, C, Hs) -> (C, H*Hs) with head h at columns h*Hs:(h+1)*Hs (torch.cat
    # order), then stack [Q | K | V] -> (C, 3*H*Hs) for a single QKV matmul.
    def _flat(w):
        return jnp.transpose(w, (1, 0, 2)).reshape(C, HH)

    w_qkv = jnp.concatenate([_flat(wq), _flat(wk), _flat(wv)], axis=-1)

    kernel = functools.partial(_mha_fused_kernel, num_heads=H, head_size=Hs)

    return pl.pallas_call(
        kernel,
        out_shape=jax.ShapeDtypeStruct((B, T, C), x.dtype),
        grid_spec=pltpu.PrefetchScalarGridSpec(
            num_scalar_prefetch=0,
            grid=(B,),  # single leading parallel axis (balanced on v7x's 2 TCs)
            in_specs=[
                pl.BlockSpec((1, T, C), lambda b: (b, 0, 0)),
                # constant block index -> weights DMA'd once, not per batch row
                pl.BlockSpec((C, 3 * HH), lambda b: (0, 0)),
                pl.BlockSpec((HH, C), lambda b: (0, 0)),
                pl.BlockSpec((1, C), lambda b: (0, 0)),
            ],
            # lane-dense output slab (C wide), written directly — no per-head
            # (T, Hs) partial stores and no XLA transpose between kernels.
            out_specs=pl.BlockSpec((1, T, C), lambda b: (b, 0, 0)),
        ),
        compiler_params=pltpu.CompilerParams(
            dimension_semantics=("parallel",)),
    )(x, w_qkv, w_proj, b_proj.reshape(1, C))


def reference_mha(x, wq, wk, wv, w_proj, b_proj):
    """Plain-JAX reference mirroring the PyTorch forward (eval mode)."""
    B, T, C = x.shape
    H, _, Hs = wq.shape
    outs = []
    for h in range(H):
        q = x @ wq[h]
        k = x @ wk[h]
        v = x @ wv[h]
        wei = (q @ jnp.swapaxes(k, -1, -2)) * (Hs ** -0.5)
        row = jnp.arange(T)[:, None]
        col = jnp.arange(T)[None, :]
        wei = jnp.where(col <= row, wei, -jnp.inf)
        wei = jax.nn.softmax(wei, axis=-1)
        outs.append(wei @ v)
    y = jnp.concatenate(outs, axis=-1)
    return y @ w_proj + b_proj


if __name__ == "__main__":
    # module config: n_embd=32, block_size=8, num_heads=4, head_size=8
    B, T, C = 2, 8, 32
    H, Hs = 4, 8

    key = jax.random.PRNGKey(0)
    k_x, k_q, k_k, k_v, k_p, k_b = jax.random.split(key, 6)

    x = jax.random.normal(k_x, (B, T, C), dtype=jnp.float32)

    # nn.Linear(n_embd, head_size, bias=False): weight (Hs, C); stored here
    # transposed as (C, Hs), stacked over heads -> (H, C, Hs)
    bound_qkv = 1.0 / math.sqrt(C)
    wq = jax.random.uniform(k_q, (H, C, Hs), jnp.float32, -bound_qkv, bound_qkv)
    wk = jax.random.uniform(k_k, (H, C, Hs), jnp.float32, -bound_qkv, bound_qkv)
    wv = jax.random.uniform(k_v, (H, C, Hs), jnp.float32, -bound_qkv, bound_qkv)

    # nn.Linear(H*Hs, C): weight (C, H*Hs) -> stored transposed (H*Hs, C)
    bound_p = 1.0 / math.sqrt(H * Hs)
    w_proj = jax.random.uniform(k_p, (H * Hs, C), jnp.float32, -bound_p, bound_p)
    b_proj = jax.random.uniform(k_b, (C,), jnp.float32, -bound_p, bound_p)

    out = multi_head_attention(x, wq, wk, wv, w_proj, b_proj)
    out = jax.block_until_ready(out)

    ref = reference_mha(x, wq, wk, wv, w_proj, b_proj)
    assert out.shape == (B, T, C), out.shape
    assert jnp.allclose(out, ref, atol=1e-5, rtol=1e-5), "mismatch vs reference"

    print("KERNEL_OK")
</pallas_src>

<mosaic_0001>
module attributes {stable_mosaic.version = 11 : i64} {
  func.func @_mha_fused_kernel(%arg0: i32, %arg1: memref<1x8x32xf32, #tpu.memory_space<vmem>>, %arg2: memref<32x96xf32, #tpu.memory_space<vmem>>, %arg3: memref<32x32xf32, #tpu.memory_space<vmem>>, %arg4: memref<1x32xf32, #tpu.memory_space<vmem>>, %arg5: memref<1x8x32xf32, #tpu.memory_space<vmem>>) attributes {dimension_semantics = [#tpu.dimension_semantics<parallel>], iteration_bounds = array<i64: 2>, scalar_prefetch = 0 : i64, scratch_operands = 0 : i64, tpu.core_type = #tpu.core_type<tc>, window_params = [{transform_indices = @transform_0, window_bounds = array<i64: 1, 8, 32>}, {pipeline_mode = #tpu.pipeline_mode<synchronous>, transform_indices = @transform_1, window_bounds = array<i64: 32, 96>}, {pipeline_mode = #tpu.pipeline_mode<synchronous>, transform_indices = @transform_2, window_bounds = array<i64: 32, 32>}, {pipeline_mode = #tpu.pipeline_mode<synchronous>, transform_indices = @transform_3, window_bounds = array<i64: 1, 32>}, {transform_indices = @transform_4, window_bounds = array<i64: 1, 8, 32>}]} {
    %c0 = arith.constant 0 : index
    %c0_0 = arith.constant 0 : index
    %c0_1 = arith.constant 0 : index
    %0 = vector.load %arg1[%c0, %c0_0, %c0_1] : memref<1x8x32xf32, #tpu.memory_space<vmem>>, vector<1x8x32xf32>
    %1 = vector.shape_cast %0 : vector<1x8x32xf32> to vector<8x32xf32>
    %c0_2 = arith.constant 0 : index
    %c0_3 = arith.constant 0 : index
    %2 = vector.load %arg2[%c0_2, %c0_3] : memref<32x96xf32, #tpu.memory_space<vmem>>, vector<32x96xf32>
    %c0_4 = arith.constant 0 : index
    %c0_5 = arith.constant 0 : index
    %3 = vector.load %arg3[%c0_4, %c0_5] : memref<32x32xf32, #tpu.memory_space<vmem>>, vector<32x32xf32>
    %c0_6 = arith.constant 0 : index
    %c0_7 = arith.constant 0 : index
    %4 = vector.load %arg4[%c0_6, %c0_7] : memref<1x32xf32, #tpu.memory_space<vmem>>, vector<1x32xf32>
    %cst = arith.constant 8.000000e+00 : f32
    %cst_8 = arith.constant -5.000000e-01 : f32
    %5 = math.powf %cst, %cst_8 : f32
    %cst_9 = arith.constant dense<0.000000e+00> : vector<8x96xf32>
    %6 = tpu.matmul %1, %2, %cst_9 {dimension_numbers = #tpu.dot_dimension_numbers<[1], [0], [0], [1], [0, 0, 1, 1], [], []>} : vector<8x32xf32>, vector<32x96xf32>, vector<8x96xf32> -> vector<8x96xf32>
    %7 = tpu.iota {dimensions = array<i32: 0>} : vector<8x8xi32>
    %8 = tpu.iota {dimensions = array<i32: 1>} : vector<8x8xi32>
    %9 = arith.cmpi sle, %8, %7 : vector<8x8xi32>
    %cst_10 = arith.constant 0.000000e+00 : f32
    %10 = vector.broadcast %cst_10 : f32 to vector<8x32xf32>
    %11 = vector.extract_strided_slice %6 {offsets = [0, 0], sizes = [8, 8], strides = [1, 1]} : vector<8x96xf32> to vector<8x8xf32>
    %12 = vector.broadcast %5 : f32 to vector<8x8xf32>
    %13 = arith.mulf %11, %12 : vector<8x8xf32>
    %14 = vector.extract_strided_slice %6 {offsets = [0, 32], sizes = [8, 8], strides = [1, 1]} : vector<8x96xf32> to vector<8x8xf32>
    %15 = vector.extract_strided_slice %6 {offsets = [0, 64], sizes = [8, 8], strides = [1, 1]} : vector<8x96xf32> to vector<8x8xf32>
    %cst_11 = arith.constant dense<0.000000e+00> : vector<8x8xf32>
    %16 = tpu.matmul %13, %14, %cst_11 {dimension_numbers = #tpu.dot_dimension_numbers<[1], [1], [0], [0], [0, 0, 1, 0], [], []>} : vector<8x8xf32>, vector<8x8xf32>, vector<8x8xf32> -> vector<8x8xf32>
    %cst_12 = arith.constant -1.000000e+30 : f32
    %17 = vector.broadcast %cst_12 : f32 to vector<8x8xf32>
    %18 = arith.select %9, %16, %17 : vector<8x8xi1>, vector<8x8xf32>
    %cst_13 = arith.constant dense<0xFF800000> : vector<8xf32>
    %19 = vector.multi_reduction <maximumf>, %18, %cst_13 [1] : vector<8x8xf32> to vector<8xf32>
    %20 = vector.shape_cast %19 : vector<8xf32> to vector<8x1xf32>
    %21 = vector.broadcast %20 : vector<8x1xf32> to vector<8x8xf32>
    %22 = arith.subf %18, %21 : vector<8x8xf32>
    %23 = math.exp %22 : vector<8x8xf32>
    %cst_14 = arith.constant dense<0.000000e+00> : vector<8xf32>
    %24 = vector.multi_reduction <add>, %23, %cst_14 [1] : vector<8x8xf32> to vector<8xf32>
    %25 = vector.shape_cast %24 : vector<8xf32> to vector<8x1xf32>
    %26 = vector.broadcast %25 : vector<8x1xf32> to vector<8x8xf32>
    %27 = arith.divf %23, %26 : vector<8x8xf32>
    %cst_15 = arith.constant dense<0.000000e+00> : vector<8x8xf32>
    %28 = tpu.matmul %27, %15, %cst_15 {dimension_numbers = #tpu.dot_dimension_numbers<[1], [0], [0], [1], [0, 0, 1, 1], [], []>} : vector<8x8xf32>, vector<8x8xf32>, vector<8x8xf32> -> vector<8x8xf32>
    %29 = vector.extract_strided_slice %3 {offsets = [0, 0], sizes = [8, 32], strides = [1, 1]} : vector<32x32xf32> to vector<8x32xf32>
    %cst_16 = arith.constant dense<0.000000e+00> : vector<8x32xf32>
    %30 = tpu.matmul %28, %29, %cst_16 {dimension_numbers = #tpu.dot_dimension_numbers<[1], [0], [0], [1], [0, 0, 1, 1], [], []>} : vector<8x8xf32>, vector<8x32xf32>, vector<8x32xf32> -> vector<8x32xf32>
    %31 = arith.addf %10, %30 : vector<8x32xf32>
    %32 = vector.extract_strided_slice %6 {offsets = [0, 8], sizes = [8, 8], strides = [1, 1]} : vector<8x96xf32> to vector<8x8xf32>
    %33 = vector.broadcast %5 : f32 to vector<8x8xf32>
    %34 = arith.mulf %32, %33 : vector<8x8xf32>
    %35 = vector.extract_strided_slice %6 {offsets = [0, 40], sizes = [8, 8], strides = [1, 1]} : vector<8x96xf32> to vector<8x8xf32>
    %36 = vector.extract_strided_slice %6 {offsets = [0, 72], sizes = [8, 8], strides = [1, 1]} : vector<8x96xf32> to vector<8x8xf32>
    %cst_17 = arith.constant dense<0.000000e+00> : vector<8x8xf32>
    %37 = tpu.matmul %34, %35, %cst_17 {dimension_numbers = #tpu.dot_dimension_numbers<[1], [1], [0], [0], [0, 0, 1, 0], [], []>} : vector<8x8xf32>, vector<8x8xf32>, vector<8x8xf32> -> vector<8x8xf32>
    %cst_18 = arith.constant -1.000000e+30 : f32
    %38 = vector.broadcast %cst_18 : f32 to vector<8x8xf32>
    %39 = arith.select %9, %37, %38 : vector<8x8xi1>, vector<8x8xf32>
    %cst_19 = arith.constant dense<0xFF800000> : vector<8xf32>
    %40 = vector.multi_reduction <maximumf>, %39, %cst_19 [1] : vector<8x8xf32> to vector<8xf32>
    %41 = vector.shape_cast %40 : vector<8xf32> to vector<8x1xf32>
    %42 = vector.broadcast %41 : vector<8x1xf32> to vector<8x8xf32>
    %43 = arith.subf %39, %42 : vector<8x8xf32>
    %44 = math.exp %43 : vector<8x8xf32>
    %cst_20 = arith.constant dense<0.000000e+00> : vector<8xf32>
    %45 = vector.multi_reduction <add>, %44, %cst_20 [1] : vector<8x8xf32> to vector<8xf32>
    %46 = vector.shape_cast %45 : vector<8xf32> to vector<8x1xf32>
    %47 = vector.broadcast %46 : vector<8x1xf32> to vector<8x8xf32>
    %48 = arith.divf %44, %47 : vector<8x8xf32>
    %cst_21 = arith.constant dense<0.000000e+00> : vector<8x8xf32>
    %49 = tpu.matmul %48, %36, %cst_21 {dimension_numbers = #tpu.dot_dimension_numbers<[1], [0], [0], [1], [0, 0, 1, 1], [], []>} : vector<8x8xf32>, vector<8x8xf32>, vector<8x8xf32> -> vector<8x8xf32>
    %50 = vector.extract_strided_slice %3 {offsets = [8, 0], sizes = [8, 32], strides = [1, 1]} : vector<32x32xf32> to vector<8x32xf32>
    %cst_22 = arith.constant dense<0.000000e+00> : vector<8x32xf32>
    %51 = tpu.matmul %49, %50, %cst_22 {dimension_numbers = #tpu.dot_dimension_numbers<[1], [0], [0], [1], [0, 0, 1, 1], [], []>} : vector<8x8xf32>, vector<8x32xf32>, vector<8x32xf32> -> vector<8x32xf32>
    %52 = arith.addf %31, %51 : vector<8x32xf32>
    %53 = vector.extract_strided_slice %6 {offsets = [0, 16], sizes = [8, 8], strides = [1, 1]} : vector<8x96xf32> to vector<8x8xf32>
    %54 = vector.broadcast %5 : f32 to vector<8x8xf32>
    %55 = arith.mulf %53, %54 : vector<8x8xf32>
    %56 = vector.extract_strided_slice %6 {offsets = [0, 48], sizes = [8, 8], strides = [1, 1]} : vector<8x96xf32> to vector<8x8xf32>
    %57 = vector.extract_strided_slice %6 {offsets = [0, 80], sizes = [8, 8], strides = [1, 1]} : vector<8x96xf32> to vector<8x8xf32>
    %cst_23 = arith.constant dense<0.000000e+00> : vector<8x8xf32>
    %58 = tpu.matmul %55, %56, %cst_23 {dimension_numbers = #tpu.dot_dimension_numbers<[1], [1], [0], [0], [0, 0, 1, 0], [], []>} : vector<8x8xf32>, vector<8x8xf32>, vector<8x8xf32> -> vector<8x8xf32>
    %cst_24 = arith.constant -1.000000e+30 : f32
    %59 = vector.broadcast %cst_24 : f32 to vector<8x8xf32>
    %60 = arith.select %9, %58, %59 : vector<8x8xi1>, vector<8x8xf32>
    %cst_25 = arith.constant dense<0xFF800000> : vector<8xf32>
    %61 = vector.multi_reduction <maximumf>, %60, %cst_25 [1] : vector<8x8xf32> to vector<8xf32>
    %62 = vector.shape_cast %61 : vector<8xf32> to vector<8x1xf32>
    %63 = vector.broadcast %62 : vector<8x1xf32> to vector<8x8xf32>
    %64 = arith.subf %60, %63 : vector<8x8xf32>
    %65 = math.exp %64 : vector<8x8xf32>
    %cst_26 = arith.constant dense<0.000000e+00> : vector<8xf32>
    %66 = vector.multi_reduction <add>, %65, %cst_26 [1] : vector<8x8xf32> to vector<8xf32>
    %67 = vector.shape_cast %66 : vector<8xf32> to vector<8x1xf32>
    %68 = vector.broadcast %67 : vector<8x1xf32> to vector<8x8xf32>
    %69 = arith.divf %65, %68 : vector<8x8xf32>
    %cst_27 = arith.constant dense<0.000000e+00> : vector<8x8xf32>
    %70 = tpu.matmul %69, %57, %cst_27 {dimension_numbers = #tpu.dot_dimension_numbers<[1], [0], [0], [1], [0, 0, 1, 1], [], []>} : vector<8x8xf32>, vector<8x8xf32>, vector<8x8xf32> -> vector<8x8xf32>
    %71 = vector.extract_strided_slice %3 {offsets = [16, 0], sizes = [8, 32], strides = [1, 1]} : vector<32x32xf32> to vector<8x32xf32>
    %cst_28 = arith.constant dense<0.000000e+00> : vector<8x32xf32>
    %72 = tpu.matmul %70, %71, %cst_28 {dimension_numbers = #tpu.dot_dimension_numbers<[1], [0], [0], [1], [0, 0, 1, 1], [], []>} : vector<8x8xf32>, vector<8x32xf32>, vector<8x32xf32> -> vector<8x32xf32>
    %73 = arith.addf %52, %72 : vector<8x32xf32>
    %74 = vector.extract_strided_slice %6 {offsets = [0, 24], sizes = [8, 8], strides = [1, 1]} : vector<8x96xf32> to vector<8x8xf32>
    %75 = vector.broadcast %5 : f32 to vector<8x8xf32>
    %76 = arith.mulf %74, %75 : vector<8x8xf32>
    %77 = vector.extract_strided_slice %6 {offsets = [0, 56], sizes = [8, 8], strides = [1, 1]} : vector<8x96xf32> to vector<8x8xf32>
    %78 = vector.extract_strided_slice %6 {offsets = [0, 88], sizes = [8, 8], strides = [1, 1]} : vector<8x96xf32> to vector<8x8xf32>
    %cst_29 = arith.constant dense<0.000000e+00> : vector<8x8xf32>
    %79 = tpu.matmul %76, %77, %cst_29 {dimension_numbers = #tpu.dot_dimension_numbers<[1], [1], [0], [0], [0, 0, 1, 0], [], []>} : vector<8x8xf32>, vector<8x8xf32>, vector<8x8xf32> -> vector<8x8xf32>
    %cst_30 = arith.constant -1.000000e+30 : f32
    %80 = vector.broadcast %cst_30 : f32 to vector<8x8xf32>
    %81 = arith.select %9, %79, %80 : vector<8x8xi1>, vector<8x8xf32>
    %cst_31 = arith.constant dense<0xFF800000> : vector<8xf32>
    %82 = vector.multi_reduction <maximumf>, %81, %cst_31 [1] : vector<8x8xf32> to vector<8xf32>
    %83 = vector.shape_cast %82 : vector<8xf32> to vector<8x1xf32>
    %84 = vector.broadcast %83 : vector<8x1xf32> to vector<8x8xf32>
    %85 = arith.subf %81, %84 : vector<8x8xf32>
    %86 = math.exp %85 : vector<8x8xf32>
    %cst_32 = arith.constant dense<0.000000e+00> : vector<8xf32>
    %87 = vector.multi_reduction <add>, %86, %cst_32 [1] : vector<8x8xf32> to vector<8xf32>
    %88 = vector.shape_cast %87 : vector<8xf32> to vector<8x1xf32>
    %89 = vector.broadcast %88 : vector<8x1xf32> to vector<8x8xf32>
    %90 = arith.divf %86, %89 : vector<8x8xf32>
    %cst_33 = arith.constant dense<0.000000e+00> : vector<8x8xf32>
    %91 = tpu.matmul %90, %78, %cst_33 {dimension_numbers = #tpu.dot_dimension_numbers<[1], [0], [0], [1], [0, 0, 1, 1], [], []>} : vector<8x8xf32>, vector<8x8xf32>, vector<8x8xf32> -> vector<8x8xf32>
    %92 = vector.extract_strided_slice %3 {offsets = [24, 0], sizes = [8, 32], strides = [1, 1]} : vector<32x32xf32> to vector<8x32xf32>
    %cst_34 = arith.constant dense<0.000000e+00> : vector<8x32xf32>
    %93 = tpu.matmul %91, %92, %cst_34 {dimension_numbers = #tpu.dot_dimension_numbers<[1], [0], [0], [1], [0, 0, 1, 1], [], []>} : vector<8x8xf32>, vector<8x32xf32>, vector<8x32xf32> -> vector<8x32xf32>
    %94 = arith.addf %73, %93 : vector<8x32xf32>
    %95 = vector.broadcast %4 : vector<1x32xf32> to vector<8x32xf32>
    %96 = arith.addf %94, %95 : vector<8x32xf32>
    %c0_35 = arith.constant 0 : index
    %c0_36 = arith.constant 0 : index
    %c0_37 = arith.constant 0 : index
    %97 = vector.load %arg5[%c0_35, %c0_36, %c0_37] : memref<1x8x32xf32, #tpu.memory_space<vmem>>, vector<1x8x32xf32>
    %98 = vector.shape_cast %97 : vector<1x8x32xf32> to vector<8x32xf32>
    %99 = vector.shape_cast %96 : vector<8x32xf32> to vector<1x8x32xf32>
    tpu.vector_store %arg5[%c0_35, %c0_36, %c0_37], %99 {strides = array<i32>} : memref<1x8x32xf32, #tpu.memory_space<vmem>>, vector<1x8x32xf32>,
    return
  }
  func.func @transform_0(%arg0: i32) -> (i32, i32, i32) {
    %c0_i32 = arith.constant 0 : i32
    %c0_i32_0 = arith.constant 0 : i32
    %c0_i32_1 = arith.constant 0 : i32
    return %arg0, %c0_i32, %c0_i32_0 : i32, i32, i32
  }
  func.func @transform_1(%arg0: i32) -> (i32, i32) {
    %c0_i32 = arith.constant 0 : i32
    %c0_i32_0 = arith.constant 0 : i32
    %c0_i32_1 = arith.constant 0 : i32
    return %c0_i32, %c0_i32_0 : i32, i32
  }
  func.func @transform_2(%arg0: i32) -> (i32, i32) {
    %c0_i32 = arith.constant 0 : i32
    %c0_i32_0 = arith.constant 0 : i32
    %c0_i32_1 = arith.constant 0 : i32
    return %c0_i32, %c0_i32_0 : i32, i32
  }
  func.func @transform_3(%arg0: i32) -> (i32, i32) {
    %c0_i32 = arith.constant 0 : i32
    %c0_i32_0 = arith.constant 0 : i32
    %c0_i32_1 = arith.constant 0 : i32
    return %c0_i32, %c0_i32_0 : i32, i32
  }
  func.func @transform_4(%arg0: i32) -> (i32, i32, i32) {
    %c0_i32 = arith.constant 0 : i32
    %c0_i32_0 = arith.constant 0 : i32
    %c0_i32_1 = arith.constant 0 : i32
    return %arg0, %c0_i32, %c0_i32_0 : i32, i32, i32
  }
}

</mosaic_0001>

<bundles_post_ra>
// kernel: tpu_custom_call.1
= control target key start
LH: loop header
LB: loop body
LE: loop exit
PB: predicated region body
PF: predicated region fallthrough
CT: control target
= control target key end

     0   :  { %9 = vsyncpa [#allocation3], 0  ;;  %s2179_s0 = inlined_call_operand.hbm [shape: f32[2,8,32], index: 0, kind: input, shape index: {}]   ;;  %s2180_s1 = inlined_call_operand.hbm [shape: f32[32,96], index: 1, kind: input, shape index: {}]   ;;  %s2181_s2 = inlined_call_operand.hbm [shape: f32[32,32], index: 2, kind: input, shape index: {}]   ;;  %s2182_s3 = inlined_call_operand.vmem [shape: f32[1,32], index: 3, kind: input, shape index: {}]   ;;  %s2183_s4 = inlined_call_operand.hbm [shape: f32[2,8,32], index: 4, kind: output, shape index: {}]  }
   0x1   :  { %11 = vsyncpa [#allocation3 + $0x1], 0 }
   0x2   :  { %12 = vsyncpa [#allocation6], 0 }
   0x3   :  { %13 = vsyncpa [#allocation4], 0 }
   0x4   :  { %15 = vsyncpa [#allocation4 + $0x1], 0  ;;  %s1844_s15 = smov 0   ;;  %s1846_s16 = smov 0  }
   0x5   :  { %s1848_s17 = smov 0   ;;  %s1850_s18 = smov 0  }
   0x6 LB: > { %s1865_s19 = sadd.s32 4294967295, %s1797_s18   ;;  %s1402_s20 = sadd.s32 4294967294, %s1797_s18   ;;  %s1797_s18 = sphi %s1850_s18, %s2203_s18   ;;  %s1793_s17 = sphi %s1848_s17, %s2202_s17   ;;  %s1789_s16 = sphi %s1846_s16, %s2201_s16   ;;  %s1785_s15 = sphi %s1844_s15, %s2200_s15  }
   0x7   : > { %p41_p0 = scmp.ne.s32.totalorder %s1789_s16, %s1785_s15  ;;  %p2184_p1 = scmp.eq.s32.totalorder %s1865_s19, 0 }
   0x8   : > { %p134_p3 = scmp.eq.s32.totalorder %s1402_s20, 1  ;;  %p1403_p5 = scmp.ge.s32.totalorder %s1797_s18, 1 }
   0x9   : > { %p1874_p4 = por %p2184_p1, %p41_p0  ;;  %p141_p7 = scmp.lt.s32.totalorder %s1797_s18, 3 }
   0xa   : > { %p1879_p6 = por %p134_p3, %p41_p0  ;;  %s1799_s24 = smov [#allocation5]  }
   0xb   : > { %s2187_s21 = scalar_select %p1874_p4, 1, 0 }
   0xc   : > { %s2188_s22 = scalar_select %p1879_p6, 1, 0 }
   0xd   : > { %p1884_p8 = pnand %p1403_p5, %p141_p7  ;;  %s153_s25 = sshll.u32 %s1799_s24, 4  ;;  %s1888_s25 = int_to_ptr.vmem [resolvable:$true] %s153_s25 }
   0xe   : > { %s1800_s27 = smov [#allocation7]   ;;  %s1641_s5 = scalar_lea.hbm %s2180_s1, 512 }
   0xf   : > { %p1554_p9 = pneg %p1884_p8  ;;  %s166_s28 = sshll.u32 %s1800_s27, 4  ;;  %s1899_s28 = int_to_ptr.vmem [resolvable:$true] %s166_s28 }
  0x10   : > { %p1642_p12 = scmp.ne.s32.totalorder %s2180_s1, %s1641_s5  ;;  %p1648_p5 = scmp.lt.u32.totalorder %s1641_s5, %s2180_s1 }
  0x11   : > { %p1895_p11 = pnand %p1554_p9, %p2184_p1 }
  0x13   : > { %p1643_p13 = pneg %p1895_p11 }
  0x15   : > { %p1644_p0 = pnand %p1643_p13, %p1642_p12 }
  0x17   : > { %p1645_p3 = pneg %p1644_p0 }
  0x19   : > { %p1650_p7 = pnand %p1648_p5, %p1645_p3 }
  0x1b   : > { %1653 = shalt.err (!%p1650_p7)
}
  0x1c   : > { %s1654_s10 = scalar_lea.vmem %s1888_s25, 512  ;;  %p1662_p2 = scmp.lt.s32.totalorder %s1888_s25, %s1888_s25 }
  0x1d   : > { %p1655_p9 = scmp.ne.s32.totalorder %s1888_s25, %s1654_s10  ;;  %p1663_p12 = scmp.lt.s32.totalorder %s1654_s10, %s1654_s10 }
  0x1f   : > { %p1657_p10 = pnand %p1655_p9, %p1643_p13  ;;  %p1664_p0 = por %p1663_p12, %p1662_p2 }
  0x21   : > { %p1658_p1 = pneg %p1657_p10 }
  0x23   : > { %p1665_p6 = pnand %p1664_p0, %p1658_p1 }
  0x25   : > { %1668 = shalt.err (!%p1665_p6)
}
  0x26   : > { %s1801_s11 = smov 128   ;;  %s1802_s12 = smov 8  }
  0x27   : > { %1557 = dma.hbm_to_vmem [thread:$0]  (!%p1895_p11), %s2180_s1, 512, %s1888_s25, [#allocation6], %s1801_s11, %s1801_s11, %s1802_s12  }
  0x28   : > { %s1669_s27 = scalar_lea.hbm %s2181_s2, 512 }
  0x29   : > { %p1670_p2 = scmp.ne.s32.totalorder %s2181_s2, %s1669_s27  ;;  %p1676_p10 = scmp.lt.u32.totalorder %s1669_s27, %s2181_s2 }
  0x2b   : > { %p1672_p1 = pnand %p1670_p2, %p1643_p13 }
  0x2d   : > { %p1673_p6 = pneg %p1672_p1 }
  0x2f   : > { %p1678_p3 = pnand %p1676_p10, %p1673_p6 }
  0x31   : > { %1681 = shalt.err (!%p1678_p3)
}
  0x32   : > { %s1682_s25 = scalar_lea.vmem %s1899_s28, 512  ;;  %p1690_p12 = scmp.lt.s32.totalorder %s1899_s28, %s1899_s28 }
  0x33   : > { %p1683_p5 = scmp.ne.s32.totalorder %s1899_s28, %s1682_s25  ;;  %p1691_p0 = scmp.lt.s32.totalorder %s1682_s25, %s1682_s25 }
  0x35   : > { %p1685_p7 = pnand %p1683_p5, %p1643_p13  ;;  %p1692_p2 = por %p1691_p0, %p1690_p12 }
  0x37   : > { %p1686_p9 = pneg %p1685_p7 }
  0x39   : > { %p1693_p1 = pnand %p1692_p2, %p1686_p9 }
  0x3b   : > { %1696 = shalt.err (!%p1693_p1)
}
  0x3c   : > { %1560 = dma.hbm_to_vmem [thread:$0]  (!%p1895_p11), %s2181_s2, 512, %s1899_s28, [#allocation6], %s1801_s11, %s1801_s11, %s1802_s12  }
  0x3d   : > { %s1954_s9 = sadd.s32 1, %s1797_s18   ;;  %s28_s26 = sadd.s32 1, %s1793_s17 }
  0x3e   : > { %s25_s10 = ssub.s32 %s1797_s18, %s1954_s9  ;;  %p35_p13 = scmp.ne.s32.totalorder %s1793_s17, %s1789_s16 }
  0x3f   : > { %p26_p6 = scmp.eq.s32.totalorder %s25_s10, 0  ;;  %p36_p10 = scmp.eq.s32.totalorder %s1797_s18, 0 }
  0x40   : > { %p2191_p3 = scmp.eq.s32.totalorder %s1865_s19, 1  ;;  %p1571_p7 = scmp.lt.s32.totalorder %s1797_s18, 2 }
  0x41   : > { %s1970_s14 = scalar_select %p26_p6, %s1793_s17, %s28_s26  }
  0x42   : > { %p1964_p5 = por %p2191_p3, %p35_p13  ;;  %p37_p9 = por %p36_p10, %p35_p13 }
  0x43   : > { %s183_s20 = sand.u32 1, %s1793_s17   ;;  %s1408_s28 = sshll.u32 %s1797_s18, 7 }
  0x44   : > { %s2192_s13 = scalar_select %p1964_p5, 1, 0 }
  0x45   : > { %s1407_s24 = sshll.u32 %s183_s20, 3  ;;  %s1977_s27 = scalar_lea.hbm %s2179_s0, %s1408_s28 }
  0x46   : > { %s187_s29 = scalar_lea.vmem [#allocation2], %s1407_s24  ;;  %p1981_p11 = pnand %p1571_p7, %p37_p9 }
  0x47   : > { %s194_s30 = sshll.u32 %s187_s29, 4  ;;  %s184_s6 = scalar_lea.sflag [#allocation3], %s183_s20  ;;  %s1979_s30 = int_to_ptr.vmem [resolvable:$true] %s194_s30 }
  0x48   : > { %s1697_s25 = scalar_lea.hbm %s1977_s27, 128  ;;  %p1699_p0 = pneg %p1981_p11 }
  0x49   : > { %p1698_p12 = scmp.ne.s32.totalorder %s1977_s27, %s1697_s25  ;;  %s1702_s26 = scalar_lea.hbm %s2179_s0, 256 }
  0x4a   : > { %p1703_p13 = scmp.lt.u32.totalorder %s1977_s27, %s2179_s0  ;;  %p1704_p6 = scmp.lt.u32.totalorder %s1702_s26, %s1697_s25 }
  0x4b   : > { %p1700_p2 = pnand %p1699_p0, %p1698_p12  ;;  %p1706_p3 = scmp.lt.u32.totalorder %s1697_s25, %s1977_s27 }
  0x4c   : > { %p1705_p10 = por %p1704_p6, %p1703_p13 }
  0x4d   : > { %p1701_p1 = pneg %p1700_p2 }
  0x4e   : > { %p1707_p7 = por %p1706_p3, %p1705_p10 }
  0x50   : > { %p1708_p9 = pnand %p1707_p7, %p1701_p1 }
  0x52   : > { %1711 = shalt.err (!%p1708_p9)
}
  0x53   : > { %s1712_s20 = scalar_lea.vmem %s1979_s30, 128  ;;  %s1803_s28 = smov [#allocation2]  }
  0x54   : > { %p1713_p12 = scmp.ne.s32.totalorder %s1979_s30, %s1712_s20  ;;  %s1717_s11 = sshll.u32 %s1803_s28, 4  ;;  %s1718_s11 = int_to_ptr.vmem [resolvable:$false] %s1717_s11 }
  0x55   : > { %s1719_s12 = scalar_lea.vmem %s1718_s11, 256  ;;  %p1720_p4 = scmp.lt.s32.totalorder %s1979_s30, %s1718_s11 }
  0x56   : > { %p1715_p2 = pnand %p1713_p12, %p1699_p0  ;;  %p1721_p13 = scmp.lt.s32.totalorder %s1719_s12, %s1712_s20 }
  0x58   : > { %p1716_p5 = pneg %p1715_p2  ;;  %p1722_p6 = por %p1721_p13, %p1720_p4 }
  0x5a   : > { %p1723_p10 = pnand %p1722_p6, %p1716_p5 }
  0x5c   : > { %1726 = shalt.err (!%p1723_p10)
}
  0x5d   : > { %1564 = dma.hbm_to_vmem [thread:$0]  (!%p1981_p11), %s1977_s27, 128, %s1979_s30, %s184_s6  }
  0x5e   : > { %203 = sbr.rel (%p1884_p8) target bundleno = 2692 (0xa84), region = 36  ;;  %s2013_s29 = sand.u32 (!%p1884_p8), 1, %s1789_s16  }
  0x5f   : > { %s1410_s25 = sshll.u32 (!%p1884_p8), %s2013_s29, 3  ;;  %s206_s7 = scalar_lea.sflag (!%p1884_p8), [#allocation3], %s2013_s29 }
  0x60   : > { %s209_s8 = scalar_lea.vmem (!%p1884_p8), [#allocation2], %s1410_s25  ;;  %p2194_p4 = scmp.ne.s32.totalorder (!%p1884_p8), %s2187_s21, 0 }
  0x65   : > { %1772 = dma.done.wait (%p2194_p4), %s206_s7, 128  }
  0x66   : > { %1774 = vsyncadd (%p2194_p4), %s206_s7, 4294967168  ;;  %p2195_p5 = scmp.eq.s32.totalorder %s1865_s19, 0 }
  0x68   : > { %1776 = dma.done.wait (%p2195_p5), [#allocation6], 1024   ;;  %p2196_p8 = pmov %p2195_p5 }
  0x69   : > { %v1804_v0 = vmov 0.0|0.0   ;;  %vm1805_vm0 = vmmov 0   ;;  %v1806_v1 = vmov 0.0   ;;  %v243_v2 = vld [vmem:[#allocation5] sm:$0xff]  ;;  %v244_v3 = vld [vmem:[#allocation5 + $0x8] sm:$0xff]  ;;  %v245_v4 = vld [vmem:[#allocation5 + $0x10] sm:$0xff]  ;;  %v326_v15 = vlaneseq }
  0x6a   : > { %1778 = vsyncadd (%p2196_p8), [#allocation6], 4294966272  ;;  %1536 = vmatprep.subr.bf16.mxu0 %v1804_v0  ;;  %1473 = vmatprep.mubr.msk.f32.mxu0 %vm1805_vm0, %v1806_v1  ;;  %v1537_v5 = vpack.c.bf16 %v244_v3, %v243_v2  ;;  %v246_v6 = vld [vmem:[#allocation5 + $0x18] sm:$0xff]  ;;  %vm252_vm1 = vcmask 261120   ;;  %s1807_s21 = smov 96   ;;  %s1808_s23 = smov 120  }
  0x6b   : > { %1476 = vmatprep.subr.mxu1 %v1806_v1  ;;  %1478 = vmatprep.mubr.msk.f32.mxu1 %vm1805_vm0, %v1806_v1  ;;  %v1540_v7 = vpack.c.bf16 %v246_v6, %v245_v4  ;;  %v242_v8 = vld [vmem:[%s209_s8] sm:$0xff]  ;;  %s1809_s27 = smov 88   ;;  %vm335_vm2 = vcmask 64512   ;;  %v2055_v16 = vshrl.u32 %v326_v15, 7  ;;  %v2057_v17 = vand.u32 127, %v326_v15  ;;  %s1810_s30 = smov 56  }
  0x6c   : > { %1538 = vmatpush3.bf16.msra.mxu0 %v1537_v5  ;;  %s1811_s5 = smov 64   ;;  %s1812_s6 = smov 80   ;;  %v248_v36 = vld [vmem:[#allocation7 + $0x8] sm:$0xff]  ;;  %v247_v45 = vld [vmem:[#allocation7] sm:$0xff] }
  0x6d   : > { %1539 = vmatprep.subr.bf16.mxu0 %v1804_v0  ;;  %vm330_vm3 = vcmp.le.s32.totalorder %v2057_v17, %v2055_v16  ;;  %s1813_s26 = smov 112   ;;  %s1814_s10 = smov 72   ;;  %v250_v16 = vld [vmem:[#allocation7 + $0x18] sm:$0xff] }
  0x6e   : > { %s1815_s24 = smov 104   ;;  %s1816_s20 = smov 48  }
  0x6f   : > { %s1817_s28 = smov 40   ;;  %s1433_s7 = sshll.u32 %s1865_s19, 7 }
  0x70   : > { %1541 = vmatpush3.bf16.msra.mxu0 %v1540_v7  ;;  %s241_s8 = scalar_lea.vmem [#allocation8], %s1410_s25  ;;  %p2197_p0 = scmp.ne.s32.totalorder %s2192_s13, 0 }
  0x71   : > { %1486 = vmatprep.subr.mxu0 %v1806_v1  ;;  %s1818_s25 = smov [#allocation8]  }
  0x73   : > { %1474 = vmatmul.mubr.msk.f32.vlgmr.msra.gmra.mrb[0].mxu0 %vm252_vm1, %v242_v8 }
  0x74   : > { %1488 = vmatprep.mubr.msk.f32.mxu0 %vm1805_vm0, %v1806_v1 }
 0x146   : > { %v2036_v9 = vpop.f32.mrb[0].mxu0 }
 0x147   : > { %333 = vrot.lane.b32.xlu0 %v2036_v9, %s1807_s21  ;;  %v1475_v10 = vpop.f32.mrb[1].mxu0  ;;  %v2040_v11 = vmul.f32 0.35355338, %v2036_v9  ;;  %s1313_s21 = sshll.u32 %s241_s8, 4  ;;  %s2136_s21 = int_to_ptr.vmem [resolvable:$true] %s1313_s21 }
 0x148   : > { %v249_v10 = vld [vmem:[#allocation7 + $0x10] sm:$0xff]  ;;  %s1727_s19 = scalar_lea.vmem %s2136_s21, 128 }
 0x149   : > { %499 = vrot.lane.b32.xlu1 %v2040_v11, %s1808_s23  ;;  %p1728_p11 = scmp.ne.s32.totalorder %s2136_s21, %s1727_s19 }
 0x14b   : > { %501 = vrot.lane.b32.xlu0 %v2036_v9, %s1809_s27  ;;  %p1729_p1 = pnand %p1728_p11, %p2197_p0 }
 0x14d   : > { %p1730_p3 = pneg %p1729_p1 }
 0x1b9   : > { %v334_v12 = vpop.permute.xlu0 %333 }
 0x1ba   : > { %1477 = vmatpush3.xpose.msk.msra.mxu1 %vm335_vm2, %v334_v12 }
 0x1bb   : > { %1481 = vmatprep.subr.mxu1 %v1806_v1  ;;  %v500_v14 = vpop.permute.xlu1 %499 }
 0x1bd   : > { %v502_v13 = vpop.permute.xlu0 %501  ;;  %1479 = vmatmul.mubr.msk.f32.vlgmr.msra.gmra.mrb[0].mxu1 %vm335_vm2, %v2040_v11 }
 0x1be   : > { %1487 = vmatpush3.xpose.msk.msra.mxu0 %vm335_vm2, %v502_v13  ;;  %1483 = vmatprep.mubr.msk.f32.mxu1 %vm1805_vm0, %v1806_v1 }
 0x1bf   : > { %1496 = vmatprep.subr.mxu0 %v1806_v1 }
 0x1c1   : > { %1489 = vmatmul.mubr.msk.f32.vlgmr.msra.gmra.mrb[2].mxu0 %vm335_vm2, %v500_v14 }
 0x1c2   : > { %1498 = vmatprep.mubr.msk.f32.mxu0 %vm1805_vm0, %v1806_v1  ;;  %1497 = vmatpush3.msra.mxu0 %v248_v36 }
 0x1c3   : > { %1506 = vmatprep.subr.mxu0 %v1806_v1 }
 0x290   : > { %v407_v18 = vpop.f32.mrb[0].mxu1 }
 0x291   : > { %v411_v19 = vsel %vm330_vm3, %v407_v18, -1e+30  ;;  %v1480_v20 = vpop.f32.mrb[1].mxu1 }
 0x292   : > { %v412_v21 = vsel %vm335_vm2, %v411_v19, -inf }
 0x293   : > { %413 = vmax.xlane.f32.xlu1 %v412_v21 }
 0x294   : > { %v573_v22 = vpop.f32.mrb[2].mxu0 }
 0x295   : > { %v577_v23 = vsel %vm330_vm3, %v573_v22, -1e+30  ;;  %v1490_v24 = vpop.f32.mrb[3].mxu0 }
 0x296   : > { %v578_v25 = vsel %vm335_vm2, %v577_v23, -inf }
 0x297   : > { %579 = vmax.xlane.f32.xlu0 %v578_v25 }
 0x320   : > { %v414_v26 = vpop.xlane.xlu1 %413 }
 0x321   : > { %v415_v27 = vsub.f32 %v411_v19, %v414_v26 }
 0x323   : > { %v416_v28 = vmul.f32 1.442695, %v415_v27 }
 0x324   : > { %v580_v29 = vpop.xlane.xlu0 %579 }
 0x325   : > { %1625 = vpow2.f32 %v416_v28  ;;  %v581_v30 = vsub.f32 %v577_v23, %v580_v29 }
 0x327   : > { %v582_v31 = vmul.f32 1.442695, %v581_v30  ;;  %v1431_v30 = vld [vmem:[%s2182_s3] ss:$0 sm:$0xff] }
 0x329   : > { %1627 = vpow2.f32 %v582_v31 }
 0x32f   : > { %v1626_v32 = vpop.eup %1625 }
 0x330   : > { %v418_v33 = vsel %vm335_vm2, %v1626_v32, 0.0 }
 0x331   : > { %419 = vadd.xlane.f32.xlu0 %v418_v33 }
 0x333   : > { %v1628_v34 = vpop.eup %1627 }
 0x334   : > { %v584_v35 = vsel %vm335_vm2, %v1628_v34, 0.0 }
 0x335   : > { %585 = vadd.xlane.f32.xlu1 %v584_v35 }
 0x346   : > { %589 = vrot.lane.b32.xlu1 %v2036_v9, %s1810_s30  ;;  %s2134_s30 = scalar_lea.hbm %s2183_s4, %s1433_s7 }
 0x347   : > { %423 = vrot.lane.b32.xlu0 %v2036_v9, %s1811_s5  ;;  %s1300_s5 = scalar_lea.sflag [#allocation4], %s2013_s29 }
 0x34a   : > { %813 = vrot.lane.b32.xlu1 %v2036_v9, %s1812_s6  ;;  %s1731_s6 = sshll.u32 %s1818_s25, 4  ;;  %s1732_s6 = int_to_ptr.vmem [resolvable:$false] %s1731_s6 }
 0x34b   : > { %811 = vrot.lane.b32.xlu0 %v2040_v11, %s1813_s26  ;;  %s1733_s26 = scalar_lea.vmem %s1732_s6, 256  ;;  %p1734_p7 = scmp.lt.s32.totalorder %s2136_s21, %s1732_s6 }
 0x34c   : > { %p1735_p9 = scmp.lt.s32.totalorder %s1733_s26, %s1727_s19 }
 0x34e   : > { %p1736_p12 = por %p1735_p9, %p1734_p7 }
 0x350   : > { %p1737_p2 = pnand %p1736_p12, %p1730_p3 }
 0x3be   : > { %v420_v37 = vpop.xlane.xlu0 %419 }
 0x3bf   : > { %1629 = vrcp.f32 %v420_v37 }
 0x3c2   : > { %v586_v38 = vpop.xlane.xlu1 %585  ;;  %v424_v39 = vpop.permute.xlu0 %423 }
 0x3c3   : > { %1631 = vrcp.f32 %v586_v38  ;;  %1482 = vmatpush3.msra.mxu1 %v424_v39 }
 0x3c4   : > { %1491 = vmatprep.subr.mxu1 %v1806_v1 }
 0x3c6   : > { %v590_v42 = vpop.permute.xlu1 %589  ;;  %v812_v51 = vpop.permute.xlu0 %811 }
 0x3c9   : > { %v1630_v40 = vpop.eup %1629 }
 0x3ca   : > { %v422_v41 = vmul.f32 %v1630_v40, %v1626_v32  ;;  %v814_v49 = vpop.permute.xlu1 %813 }
 0x3cc   : > { %1484 = vmatmul.mubr.msk.f32.vlgmr.msra.gmra.mrb[2].mxu1 %vm335_vm2, %v422_v41 }
 0x3cd   : > { %v1632_v43 = vpop.eup %1631  ;;  %1492 = vmatpush3.msra.mxu1 %v590_v42  ;;  %1493 = vmatprep.mubr.msk.f32.mxu1 %vm1805_vm0, %v1806_v1 }
 0x3ce   : > { %v588_v44 = vmul.f32 %v1632_v43, %v1628_v34  ;;  %1501 = vmatprep.subr.mxu1 %v1806_v1 }
 0x3d0   : > { %1494 = vmatmul.mubr.msk.f32.vlgmr.msra.gmra.mrb[4].mxu1 %vm335_vm2, %v588_v44 }
 0x3d1   : > { %1503 = vmatprep.mubr.msk.f32.mxu1 %vm1805_vm0, %v1806_v1  ;;  %1502 = vmatpush3.msra.mxu1 %v247_v45 }
 0x3d2   : > { %1511 = vmatprep.subr.mxu1 %v1806_v1 }
 0x49f   : > { %v495_v46 = vpop.f32.mrb[2].mxu1 }
 0x4a0   : > { %v1485_v47 = vpop.f32.mrb[3].mxu1  ;;  %1504 = vmatmul.mubr.msk.f32.vlgmr.msra.gmra.mrb[6].mxu1 %vm335_vm2, %v495_v46 }
 0x4a1   : > { %1513 = vmatprep.mubr.msk.f32.mxu1 %vm1805_vm0, %v1806_v1 }
 0x4a3   : > { %v661_v48 = vpop.f32.mrb[4].mxu1 }
 0x4a4   : > { %v1495_v50 = vpop.f32.mrb[5].mxu1  ;;  %1499 = vmatmul.mubr.msk.f32.vlgmr.msra.gmra.mrb[4].mxu0 %vm335_vm2, %v661_v48 }
 0x4a5   : > { %1507 = vmatpush3.xpose.msk.msra.mxu0 %vm335_vm2, %v814_v49  ;;  %1508 = vmatprep.mubr.msk.f32.mxu0 %vm1805_vm0, %v1806_v1 }
 0x4a6   : > { %1516 = vmatprep.subr.mxu0 %v1806_v1 }
 0x4a8   : > { %1509 = vmatmul.mubr.msk.f32.vlgmr.msra.gmra.mrb[6].mxu0 %vm335_vm2, %v812_v51 }
 0x4a9   : > { %1518 = vmatprep.mubr.msk.f32.mxu0 %vm1805_vm0, %v1806_v1  ;;  %1517 = vmatpush3.msra.mxu0 %v249_v10 }
 0x4aa   : > { %1526 = vmatprep.subr.mxu0 %v1806_v1 }
 0x573   : > { %v807_v52 = vpop.f32.mrb[6].mxu1 }
 0x574   : > { %v1505_v53 = vpop.f32.mrb[7].mxu1 }
 0x577   : > { %v734_v54 = vpop.f32.mrb[4].mxu0 }
 0x578   : > { %v808_v55 = vadd.f32 %v807_v52, %v734_v54  ;;  %v1500_v56 = vpop.f32.mrb[5].mxu0 }
 0x57b   : > { %v885_v57 = vpop.f32.mrb[6].mxu0 }
 0x57c   : > { %v889_v58 = vsel %vm330_vm3, %v885_v57, -1e+30  ;;  %v1510_v59 = vpop.f32.mrb[7].mxu0 }
 0x57d   : > { %v890_v60 = vsel %vm335_vm2, %v889_v58, -inf }
 0x57e   : > { %891 = vmax.xlane.f32.xlu1 %v890_v60 }
 0x58f   : > { %1053 = vrot.lane.b32.xlu1 %v2036_v9, %s1814_s10 }
 0x593   : > { %1051 = vrot.lane.b32.xlu1 %v2040_v11, %s1815_s24 }
 0x60b   : > { %v892_v61 = vpop.xlane.xlu1 %891 }
 0x60c   : > { %v893_v62 = vsub.f32 %v889_v58, %v892_v61 }
 0x60e   : > { %v894_v63 = vmul.f32 1.442695, %v893_v62 }
 0x60f   : > { %v1054_v6 = vpop.permute.xlu1 %1053 }
 0x610   : > { %1633 = vpow2.f32 %v894_v63 }
 0x613   : > { %v1052_v8 = vpop.permute.xlu1 %1051 }
 0x61a   : > { %v1634_v0 = vpop.eup %1633 }
 0x61b   : > { %v896_v2 = vsel %vm335_vm2, %v1634_v0, 0.0 }
 0x61c   : > { %897 = vadd.xlane.f32.xlu0 %v896_v2 }
 0x632   : > { %901 = vrot.lane.b32.xlu0 %v2036_v9, %s1816_s20 }
 0x6a9   : > { %v898_v3 = vpop.xlane.xlu0 %897 }
 0x6aa   : > { %1635 = vrcp.f32 %v898_v3 }
 0x6ad   : > { %v902_v4 = vpop.permute.xlu0 %901 }
 0x6ae   : > { %1512 = vmatpush3.msra.mxu1 %v902_v4 }
 0x6af   : > { %1521 = vmatprep.subr.mxu1 %v1806_v1 }
 0x6b4   : > { %v1636_v5 = vpop.eup %1635 }
 0x6b5   : > { %v900_v7 = vmul.f32 %v1636_v5, %v1634_v0 }
 0x6b7   : > { %1514 = vmatmul.mubr.msk.f32.vlgmr.msra.gmra.mrb[8].mxu1 %vm335_vm2, %v900_v7 }
 0x6b8   : > { %1522 = vmatpush3.xpose.msk.msra.mxu1 %vm335_vm2, %v1054_v6  ;;  %1523 = vmatprep.mubr.msk.f32.mxu1 %vm1805_vm0, %v1806_v1 }
 0x6b9   : > { %1531 = vmatprep.subr.mxu1 %v1806_v1 }
 0x6bb   : > { %1524 = vmatmul.mubr.msk.f32.vlgmr.msra.gmra.mrb[10].mxu1 %vm335_vm2, %v1052_v8 }
 0x6bc   : > { %1533 = vmatprep.mubr.msk.f32.mxu1 %vm1805_vm0, %v1806_v1  ;;  %1532 = vmatpush3.msra.mxu1 %v250_v16 }
 0x78a   : > { %v973_v11 = vpop.f32.mrb[8].mxu1 }
 0x78b   : > { %v1515_v12 = vpop.f32.mrb[9].mxu1  ;;  %1519 = vmatmul.mubr.msk.f32.vlgmr.msra.gmra.mrb[8].mxu0 %vm335_vm2, %v973_v11 }
 0x78c   : > { %1528 = vmatprep.mubr.msk.f32.mxu0 %vm1805_vm0, %v1806_v1 }
 0x78e   : > { %v1125_v13 = vpop.f32.mrb[10].mxu1 }
 0x78f   : > { %v1129_v14 = vsel %vm330_vm3, %v1125_v13, -1e+30  ;;  %v1525_v15 = vpop.f32.mrb[11].mxu1 }
 0x790   : > { %v1130_v18 = vsel %vm335_vm2, %v1129_v14, -inf }
 0x791   : > { %1131 = vmax.xlane.f32.xlu0 %v1130_v18 }
 0x7a7   : > { %1141 = vrot.lane.b32.xlu0 %v2036_v9, %s1817_s28 }
 0x81e   : > { %v1132_v19 = vpop.xlane.xlu0 %1131 }
 0x81f   : > { %v1133_v20 = vsub.f32 %v1129_v14, %v1132_v19 }
 0x821   : > { %v1134_v21 = vmul.f32 1.442695, %v1133_v20 }
 0x822   : > { %v1142_v22 = vpop.permute.xlu0 %1141 }
 0x823   : > { %1637 = vpow2.f32 %v1134_v21  ;;  %1527 = vmatpush3.msra.mxu0 %v1142_v22 }
 0x82d   : > { %v1638_v23 = vpop.eup %1637 }
 0x82e   : > { %v1136_v1 = vsel %vm335_vm2, %v1638_v23, 0.0 }
 0x82f   : > { %1137 = vadd.xlane.f32.xlu1 %v1136_v1 }
 0x85e   : > { %v1046_v17 = vpop.f32.mrb[8].mxu0 }
 0x85f   : > { %v1050_v24 = vadd.f32 %v1046_v17, %v808_v55  ;;  %v1520_v25 = vpop.f32.mrb[9].mxu0 }
 0x8bc   : > { %v1138_v26 = vpop.xlane.xlu1 %1137 }
 0x8bd   : > { %1639 = vrcp.f32 %v1138_v26 }
 0x8c7   : > { %v1640_v9 = vpop.eup %1639 }
 0x8c8   : > { %v1140_v27 = vmul.f32 %v1640_v9, %v1638_v23 }
 0x8ca   : > { %1529 = vmatmul.mubr.msk.f32.vlgmr.msra.gmra.mrb[10].mxu0 %vm335_vm2, %v1140_v27 }
 0x99d   : > { %v1213_v28 = vpop.f32.mrb[10].mxu0 }
 0x99e   : > { %v1530_v29 = vpop.f32.mrb[11].mxu0  ;;  %1534 = vmatmul.mubr.msk.f32.vlgmr.msra.gmra.mrb[12].mxu1 %vm335_vm2, %v1213_v28 }
 0xa71   : > { %v1286_v31 = vpop.f32.mrb[12].mxu1 }
 0xa72   : > { %v1290_v32 = vadd.f32 %v1286_v31, %v1050_v24  ;;  %v1535_v33 = vpop.f32.mrb[13].mxu1 }
 0xa74   : > { %v1297_v34 = vadd.f32 %v1431_v30, %v1290_v32 }
 0xa76   : > { %1298 = vst.msk [vmem:[%s241_s8] sm:$0xff] %vm252_vm1, %v1297_v34 }
 0xa77   : > { %1740 = shalt.err (!%p1737_p2)
}
 0xa78   : > { %s1741_s29 = scalar_lea.hbm %s2134_s30, 128  ;;  %s1745_s20 = scalar_lea.hbm %s2183_s4, 256 }
 0xa79   : > { %p1742_p13 = scmp.ne.s32.totalorder %s2134_s30, %s1741_s29  ;;  %p1746_p4 = scmp.lt.u32.totalorder %s2134_s30, %s2183_s4 }
 0xa7a   : > { %p1747_p5 = scmp.lt.u32.totalorder %s1745_s20, %s1741_s29  ;;  %p1749_p11 = scmp.lt.u32.totalorder %s1741_s29, %s2134_s30 }
 0xa7b   : > { %p1743_p6 = pnand %p1742_p13, %p2197_p0 }
 0xa7c   : > { %p1748_p8 = por %p1747_p5, %p1746_p4 }
 0xa7d   : > { %p1744_p10 = pneg %p1743_p6 }
 0xa7e   : > { %p1750_p1 = por %p1749_p11, %p1748_p8 }
 0xa80   : > { %p1751_p3 = pnand %p1750_p1, %p1744_p10 }
 0xa82   : > { %1754 = shalt.err (!%p1751_p3)
}
 0xa83   : > { %1552 = dma.vmem_to_hbm [thread:$0]  (%p2197_p0), %s2136_s21, 128, %s2134_s30, %s1300_s5  }
 0xa84 PF: > { %s1325_s12 = sand.u32 1, %s1785_s15   ;;  %p2198_p7 = scmp.ne.s32.totalorder %s2188_s22, 0 }
 0xa85   : > { %p2199_p9 = scmp.ge.s32.totalorder %s1797_s18, 2  ;;  %s1326_s7 = scalar_lea.sflag [#allocation4], %s1325_s12 }
 0xa87   : > { %p1566_p12 = pnand %p2199_p9, %p2198_p7 }
 0xa89   : > { %1780 = dma.done.wait (!%p1566_p12), %s1326_s7, 128  }
 0xa8a   : > { %1782 = vsyncadd (!%p1566_p12), %s1326_s7, 4294967168  ;;  %p18_p2 = scmp.ge.s32.totalorder %s1954_s9, 4   ;;  %s2200_s15 = smov %s1789_s16 }
 0xa8b   : > { %s2201_s16 = smov %s1793_s17  ;;  %s2202_s17 = smov %s1970_s14 }
 0xa8c   : > { %s2203_s18 = smov %s1954_s9  ;;  %20 = sbr.rel (!%p18_p2) target bundleno = 6 (0x6), region = 89 }
 0xa93   :  { %1331 = vsyncpa [#allocation3], 1 }
 0xa94   :  { %1333 = vsyncpa [#allocation3 + $0x1], 1 }
 0xa95   :  { %1334 = vsyncpa [#allocation6], 1 }
 0xa96   :  { %1335 = vsyncpa [#allocation4], 1 }
 0xa97   :  { %1337 = vsyncpa [#allocation4 + $0x1], 1 }

</bundles_post_ra>
